<compile_context>
chip_gen: v5e
topology: v5e:2x2
jax: 0.10.0
libtpu: 0.0.40
codegen_flags: <defaults>
</compile_context>

<pallas_src>
import functools
import math

import jax
import jax.numpy as jnp
from jax.experimental import pallas as pl
from jax.experimental.pallas import tpu as pltpu

_MIN_PALLAS_BYTES = 1 * 1024 * 1024  # below this a standalone transpose kernel is pure overhead


def _sublane_multiple(itemsize: int) -> int:
    """Minimal sublane tiling multiple per dtype: 8 (f32), 16 (bf16), 32 (int8/fp8)."""
    return max(8, 32 // max(itemsize, 1))


def _divisors(n: int):
    ds = set()
    i = 1
    while i * i <= n:
        if n % i == 0:
            ds.add(i)
            ds.add(n // i)
        i += 1
    return sorted(ds)


@functools.lru_cache(maxsize=None)
def _tuning():
    """Generation-aware byte budgets: (soft_block_cap, hard_block_cap, vmem_limit)."""
    vmem_phys = None
    try:
        vmem_phys = getattr(pltpu.get_tpu_info(), "vmem_capacity_bytes", None)
    except Exception:
        vmem_phys = None
    if vmem_phys is None:
        vmem_phys = 64 * 1024 * 1024  # conservative (v7x-sized) default
    if vmem_phys >= 128 * 1024 * 1024:
        # v5e / v6e: 128 MiB physical VMEM -> ~8 MiB blocks
        # (in + out, double-buffered => ~32 MiB live).
        soft_cap = 8 * 1024 * 1024
        vmem_limit = 64 * 1024 * 1024
    else:
        # v7x: 64 MiB physical VMEM per TensorCore -> ~4 MiB blocks
        # (still large enough to hide the ~0.35 us per-step overhead at 3.2 TB/s HBM).
        soft_cap = 4 * 1024 * 1024
        vmem_limit = 32 * 1024 * 1024
    # Hard cap: never pick a block that cannot be double-buffered (in + out)
    # inside the VMEM budget -> avoids the compile-failure mode flagged in review.
    hard_cap = vmem_limit // 6
    return soft_cap, hard_cap, vmem_limit


def _pick_tiles(A, B, T, itemsize, sub, soft_cap, hard_cap):
    """Pick (ta, tb) for blocks in=(ta, tb*T) / out=(tb, ta*T).

    Legality ((8,128) rule on the squeezed VMEM blocks, dtype-aware sublane `sub`):
      ta % sub == 0 or ta == A ;  tb % sub == 0 or tb == B        (sublane dims)
      (tb*T) % 128 == 0 or tb == B ; (ta*T) % 128 == 0 or ta == A (folded lane dims)
    Preference: fits the per-generation soft cap > both lane dims 128-dense >
    largest block (smallest if over the soft cap) > widest narrow side.
    Returns None if nothing fits the hard (VMEM-safety) cap.
    """
    best_key, best = None, None
    for ta in _divisors(A):
        if not (ta % sub == 0 or ta == A):
            continue
        if not (((ta * T) % 128 == 0) or (ta == A)):  # output block lane legality
            continue
        for tb in _divisors(B):
            if not (tb % sub == 0 or tb == B):
                continue
            if not (((tb * T) % 128 == 0) or (tb == B)):  # input block lane legality
                continue
            nbytes = ta * tb * T * itemsize
            if nbytes > hard_cap:
                continue
            fits = nbytes <= soft_cap
            dense = int((ta * T) % 128 == 0) + int((tb * T) % 128 == 0)
            key = (fits, dense, nbytes if fits else -nbytes, min(ta * T, tb * T))
            if best_key is None or key > best_key:
                best_key, best = key, (ta, tb)
    return best


def swap_axes(x: jax.Array, a: int, b: int, *, force_pallas: bool = False) -> jax.Array:
    """Pallas-backed equivalent of torch.swapaxes(x, a, b)."""
    ndim = x.ndim
    a = a % ndim
    b = b % ndim
    if a == b:
        return x  # identity swap: no kernel, no copy
    if a > b:
        a, b = b, a

    shape = x.shape
    out_dims = list(shape)
    out_dims[a], out_dims[b] = out_dims[b], out_dims[a]
    out_dims = tuple(out_dims)

    itemsize = x.dtype.itemsize
    total_bytes = x.size * itemsize
    if x.size == 0 or ((not force_pallas) and total_bytes < _MIN_PALLAS_BYTES):
        # 0-FLOP op: for tiny/empty tensors let XLA emit / absorb the transpose.
        return jnp.swapaxes(x, a, b)

    P = math.prod(shape[:a])
    A = shape[a]
    M = math.prod(shape[a + 1:b])
    B = shape[b]
    T = math.prod(shape[b + 1:])
    sub = _sublane_multiple(itemsize)
    soft_cap, hard_cap, vmem_limit = _tuning()

    tiles = _pick_tiles(A, B, T, itemsize, sub, soft_cap, hard_cap)
    if tiles is None:
        # Pathological shape: no legal tile fits the VMEM budget.  Correctness
        # (and not blowing vmem_limit_bytes) beats forcing a kernel.
        return jnp.swapaxes(x, a, b)
    ta, tb = tiles

    # Lane-dense fold on both sides of the swap.
    x_in = x.reshape(P, A, M, B * T)
    grid = (P, M, A // ta, B // tb)

    def kernel(x_ref, o_ref):
        # x_ref: (ta, tb*T)  ->  o_ref: (tb, ta*T)
        if T == 1:
            o_ref[...] = x_ref[...].T
        else:
            blk = x_ref[...].reshape(ta, tb, T)
            o_ref[...] = jnp.swapaxes(blk, 0, 1).reshape(tb, ta * T)

    out = pl.pallas_call(
        kernel,
        grid=grid,
        in_specs=[
            pl.BlockSpec((None, ta, None, tb * T), lambda p, m, i, j: (p, i, m, j)),
        ],
        out_specs=pl.BlockSpec((None, tb, None, ta * T), lambda p, m, i, j: (p, j, m, i)),
        out_shape=jax.ShapeDtypeStruct((P, B, M, A * T), x.dtype),
        compiler_params=pltpu.CompilerParams(
            # All axes independent; when P == 1 (axis-0 swaps) the A/B tile
            # axes still carry parallelism for the v7x megacore sharder.
            dimension_semantics=("parallel", "parallel", "parallel", "parallel"),
            vmem_limit_bytes=vmem_limit,
        ),
        cost_estimate=pl.CostEstimate(
            flops=0, transcendentals=0, bytes_accessed=2 * total_bytes),
    )(x_in)
    return out.reshape(out_dims)


if __name__ == "__main__":
    # SwapAxes(a=1, b=2), as used in MaxViT partition attention (NCHW input).
    a_axis, b_axis = 1, 2

    key = jax.random.PRNGKey(0)
    x = jax.random.normal(key, (2, 4, 16, 16), dtype=jnp.float32)  # [B, C, H, W]

    # force_pallas=True: the 8 KiB demo tensor would otherwise take the
    # jnp.swapaxes small-size fast path; we want to exercise the kernel here.
    swap_fn = jax.jit(functools.partial(swap_axes, a=a_axis, b=b_axis, force_pallas=True))
    y = jax.block_until_ready(swap_fn(x))

    ref = jnp.swapaxes(x, a_axis, b_axis)
    assert y.shape == ref.shape, (y.shape, ref.shape)
    assert y.dtype == ref.dtype, (y.dtype, ref.dtype)
    assert bool(jnp.array_equal(y, ref)), "mismatch vs jnp.swapaxes reference"

    # Non-adjacent swap with untouched middle dims (exercises the M > 1 folded path).
    swap_fn2 = jax.jit(functools.partial(swap_axes, a=0, b=2, force_pallas=True))
    y2 = jax.block_until_ready(swap_fn2(x))
    ref2 = jnp.swapaxes(x, 0, 2)
    assert y2.shape == ref2.shape, (y2.shape, ref2.shape)
    assert bool(jnp.array_equal(y2, ref2)), "mismatch vs jnp.swapaxes reference (M>1 path)"

    # Identity swap is a true no-op: no kernel launch, no HBM traffic.
    assert swap_axes(x, 1, 1) is x

    print("KERNEL_OK")
</pallas_src>

<mosaic_0001>
module attributes {stable_mosaic.version = 11 : i64} {
  func.func @kernel(%arg0: i32, %arg1: i32, %arg2: i32, %arg3: i32, %arg4: memref<1x4x1x256xf32, #tpu.memory_space<vmem>>, %arg5: memref<1x16x1x64xf32, #tpu.memory_space<vmem>>) attributes {dimension_semantics = [#tpu.dimension_semantics<parallel>, #tpu.dimension_semantics<parallel>, #tpu.dimension_semantics<parallel>, #tpu.dimension_semantics<parallel>], iteration_bounds = array<i64: 2, 1, 1, 1>, scalar_prefetch = 0 : i64, scratch_operands = 0 : i64, tpu.core_type = #tpu.core_type<tc>, window_params = [{transform_indices = @transform_0, window_bounds = array<i64: 1, 4, 1, 256>}, {transform_indices = @transform_1, window_bounds = array<i64: 1, 16, 1, 64>}]} {
    %c0 = arith.constant 0 : index
    %c0_0 = arith.constant 0 : index
    %c0_1 = arith.constant 0 : index
    %c0_2 = arith.constant 0 : index
    %0 = vector.load %arg4[%c0, %c0_0, %c0_1, %c0_2] : memref<1x4x1x256xf32, #tpu.memory_space<vmem>>, vector<1x4x1x256xf32>
    %1 = vector.shape_cast %0 : vector<1x4x1x256xf32> to vector<4x256xf32>
    %2 = vector.shape_cast %1 : vector<4x256xf32> to vector<4x16x16xf32>
    %3 = tpu.transpose %2, [1, 0, 2] : vector<4x16x16xf32> -> vector<16x4x16xf32>
    %4 = vector.shape_cast %3 : vector<16x4x16xf32> to vector<16x64xf32>
    %c0_3 = arith.constant 0 : index
    %c0_4 = arith.constant 0 : index
    %c0_5 = arith.constant 0 : index
    %c0_6 = arith.constant 0 : index
    %5 = vector.load %arg5[%c0_3, %c0_4, %c0_5, %c0_6] : memref<1x16x1x64xf32, #tpu.memory_space<vmem>>, vector<1x16x1x64xf32>
    %6 = vector.shape_cast %5 : vector<1x16x1x64xf32> to vector<16x64xf32>
    %7 = vector.shape_cast %4 : vector<16x64xf32> to vector<1x16x1x64xf32>
    tpu.vector_store %arg5[%c0_3, %c0_4, %c0_5, %c0_6], %7 {strides = array<i32>} : memref<1x16x1x64xf32, #tpu.memory_space<vmem>>, vector<1x16x1x64xf32>,
    return
  }
  func.func @transform_0(%arg0: i32, %arg1: i32, %arg2: i32, %arg3: i32) -> (i32, i32, i32, i32) {
    %c0_i32 = arith.constant 0 : i32
    return %arg0, %arg2, %arg1, %arg3 : i32, i32, i32, i32
  }
  func.func @transform_1(%arg0: i32, %arg1: i32, %arg2: i32, %arg3: i32) -> (i32, i32, i32, i32) {
    %c0_i32 = arith.constant 0 : i32
    return %arg0, %arg3, %arg1, %arg2 : i32, i32, i32, i32
  }
}

</mosaic_0001>

<bundles_post_ra>
// kernel: swap_axes.1
= control target key start
LH: loop header
LB: loop body
LE: loop exit
PB: predicated region body
PF: predicated region fallthrough
CT: control target
= control target key end

     0   :  { %s782_s6 = smov 0   ;;  %s784_s7 = smov 0   ;;  %s1111_s0 = inlined_call_operand.vmem [shape: f32[2,4,1,256], index: 0, kind: input, shape index: {}]   ;;  %s1112_s1 = inlined_call_operand.vmem [shape: f32[2,16,1,64], index: 1, kind: output, shape index: {}]  }
   0x1   :  { %s786_s8 = smov 0  }
   0x2 LB: > { %s37_s9 = sadd.s32 1, %s759_s7  ;;  %p705_p0 = scmp.ge.s32.totalorder %s763_s8, 1  ;;  %s763_s8 = sphi %s786_s8, %s11_s8   ;;  %s759_s7 = sphi %s784_s7, %s1114_s7   ;;  %s755_s6 = sphi %s782_s6, %s1113_s6  }
   0x3   : > { %p39_p1 = scmp.ge.s32.totalorder %s37_s9, 2  ;;  %p139_p2 = scmp.lt.s32.totalorder %s763_s8, 3 }
   0x5   : > { %s1116_s9 = smov (%p39_p1, %s37_s9), 0  ;;  %p140_p3 = pnand %p705_p0, %p139_p2 }
   0x6   : > { %p182_p4 = scmp.lt.s32.totalorder (!%p140_p3), %s755_s6, 1  ;;  %s765_s14 = smov (!%p140_p3), 112  }
   0x7   : > { %143 = sbr.rel (%p140_p3) target bundleno = 411 (0x19b), region = 24  ;;  %s766_s15 = smov (!%p140_p3), 96  }
   0x8   : > { %s767_s16 = smov (!%p140_p3), 80   ;;  %s768_s17 = smov (!%p140_p3), 64  }
   0x9   : > { %s769_s18 = smov (!%p140_p3), 48   ;;  %s770_s19 = smov (!%p140_p3), 32  }
   0xa   : > { %s771_s20 = smov (!%p140_p3), 16  }
   0xc   : > { %s1118_s6 = smov (!%p182_p4, %s755_s6), 1  ;;  %vm517_vm0 = vcmask 130048   ;;  %vm534_vm1 = vcmask 261120   ;;  %vm551_vm2 = vcmask 392192   ;;  %vm568_vm3 = vcmask 516096  }
   0xd   : > { %s706_s10 = sshll.u32 %s1118_s6, 3  ;;  %s707_s21 = sshll.u32 %s1118_s6, 4 }
   0xe   : > { %s196_s13 = scalar_lea.vmem %s1111_s0, %s706_s10  ;;  %s1006_s24 = scalar_lea.vmem %s1112_s1, %s707_s21 }
   0xf   : > { %v806_v0 = vld [vmem:[%s196_s13 + $0x4] sm:$0x3]  ;;  %v808_v1 = vld [vmem:[%s196_s13] sm:$0x3]  ;;  %v813_v2 = vld [vmem:[%s196_s13 + $0x6] sm:$0x3] }
  0x10   : > { %231 = vrot.lane.b32.xlu1 %v806_v0, %s765_s14  ;;  %240 = vrot.lane.b32.xlu2 %v808_v1, %s766_s15  ;;  %v215_v3 = vld [vmem:[%s196_s13 + $0x2] sm:$0x3]  ;;  %v389_v6 = vperm.slane %v806_v0, 0 }
  0x11   : > { %227 = vrot.lane.b32.xlu0 %v808_v1, %s765_s14  ;;  %v223_v4 = vrot.slane %v215_v3, 1  ;;  %v325_v10 = vperm.slane %v215_v3, 0 }
  0x13   : > { %v333_v5 = vperm.slane %v223_v4, 0 }
  0x18   : > { %233 = vrot.lane.b32.xlu1 %v813_v2, %s765_s14  ;;  %242 = vrot.lane.b32.xlu2 %v215_v3, %s766_s15 }
  0x19   : > { %229 = vrot.lane.b32.xlu0 %v215_v3, %s765_s14 }
  0x20   : > { %246 = vrot.lane.b32.xlu1 %v813_v2, %s766_s15  ;;  %253 = vrot.lane.b32.xlu2 %v808_v1, %s767_s16 }
  0x21   : > { %244 = vrot.lane.b32.xlu0 %v806_v0, %s766_s15 }
  0x28   : > { %257 = vrot.lane.b32.xlu1 %v806_v0, %s767_s16  ;;  %259 = vrot.lane.b32.xlu2 %v813_v2, %s767_s16 }
  0x29   : > { %255 = vrot.lane.b32.xlu0 %v215_v3, %s767_s16 }
  0x30   : > { %268 = vrot.lane.b32.xlu1 %v215_v3, %s768_s17  ;;  %270 = vrot.lane.b32.xlu2 %v806_v0, %s768_s17 }
  0x31   : > { %266 = vrot.lane.b32.xlu0 %v808_v1, %s768_s17 }
  0x38   : > { %279 = vrot.lane.b32.xlu1 %v808_v1, %s769_s18  ;;  %281 = vrot.lane.b32.xlu2 %v215_v3, %s769_s18 }
  0x39   : > { %272 = vrot.lane.b32.xlu0 %v813_v2, %s768_s17 }
  0x40   : > { %285 = vrot.lane.b32.xlu1 %v813_v2, %s769_s18  ;;  %292 = vrot.lane.b32.xlu2 %v808_v1, %s770_s19 }
  0x41   : > { %283 = vrot.lane.b32.xlu0 %v806_v0, %s769_s18 }
  0x48   : > { %296 = vrot.lane.b32.xlu1 %v806_v0, %s770_s19  ;;  %298 = vrot.lane.b32.xlu2 %v813_v2, %s770_s19 }
  0x49   : > { %294 = vrot.lane.b32.xlu0 %v215_v3, %s770_s19 }
  0x50   : > { %307 = vrot.lane.b32.xlu1 %v215_v3, %s771_s20  ;;  %309 = vrot.lane.b32.xlu2 %v806_v0, %s771_s20 }
  0x51   : > { %305 = vrot.lane.b32.xlu0 %v808_v1, %s771_s20 }
  0x58   : > { %405 = vrot.lane.b32.xlu2 %v389_v6, %s770_s19  ;;  %341 = vrot.lane.b32.xlu1 %v325_v10, %s771_s20  ;;  %v453_v6 = vperm.slane %v813_v2, 0 }
  0x59   : > { %311 = vrot.lane.b32.xlu0 %v813_v2, %s771_s20 }
  0x61   : > { %357 = vrot.lane.b32.xlu0 %v333_v5, %s771_s20 }
  0x6a   : > { %v848_v7 = vpop.permute.xlu2 %240 }
  0x72   : > { %v850_v8 = vpop.permute.xlu2 %242 }
  0x73   : > { %v327_v9 = vperm.slane %v850_v8, 0  ;;  %v249_v52 = vrot.slane %v850_v8, 1  ;;  %v224_v8 = vrot.slane %v806_v0, 1 }
  0x75   : > { %345 = vrot.lane.b32.xlu0 %v327_v9, %s771_s20  ;;  %v335_v55 = vperm.slane %v249_v52, 0  ;;  %v397_v10 = vperm.slane %v224_v8, 0 }
  0x7a   : > { %v855_v11 = vpop.permute.xlu2 %253 }
  0x82   : > { %v857_v12 = vpop.permute.xlu1 %231  ;;  %v859_v13 = vpop.permute.xlu2 %259 }
  0x83   : > { %v861_v14 = vpop.permute.xlu0 %227  ;;  %v390_v24 = vperm.slane %v857_v12, 0  ;;  %v237_v9 = vrot.slane %v857_v12, 1  ;;  %v264_v52 = vrot.slane %v859_v13, 1 }
  0x8a   : > { %v863_v15 = vpop.permute.xlu1 %233  ;;  %v865_v16 = vpop.permute.xlu2 %270 }
  0x8b   : > { %v230_v17 = vpop.permute.xlu0 %229  ;;  %v393_v46 = vperm.slane %v865_v16, 0 }
  0x8c   : > { %v326_v18 = vperm.slane %v230_v17, 0  ;;  %v236_v47 = vrot.slane %v230_v17, 1  ;;  %v398_v17 = vperm.slane %v237_v9, 0 }
  0x8e   : > { %343 = vrot.lane.b32.xlu2 %v326_v18, %s771_s20  ;;  %v334_v50 = vperm.slane %v236_v47, 0 }
  0x92   : > { %v868_v19 = vpop.permute.xlu1 %246  ;;  %v282_v20 = vpop.permute.xlu2 %281 }
  0x93   : > { %v330_v21 = vperm.slane %v282_v20, 0  ;;  %v245_v22 = vpop.permute.xlu0 %244  ;;  %v288_v59 = vrot.slane %v282_v20, 1  ;;  %v456_v20 = vperm.slane %v859_v13, 0 }
  0x94   : > { %v391_v45 = vperm.slane %v245_v22, 0  ;;  %v250_v54 = vrot.slane %v245_v22, 1 }
  0x95   : > { %351 = vrot.lane.b32.xlu0 %v330_v21, %s771_s20  ;;  %v338_v62 = vperm.slane %v288_v59, 0  ;;  %v276_v21 = vrot.slane %v865_v16, 1  ;;  %v238_v16 = vrot.slane %v863_v15, 1 }
  0x96   : > { %v399_v57 = vperm.slane %v250_v54, 0  ;;  %v464_v54 = vperm.slane %v264_v52, 0 }
  0x97   : > { %v401_v0 = vperm.slane %v276_v21, 0 }
  0x9a   : > { %v871_v23 = vpop.permute.xlu1 %257  ;;  %v886_v36 = vpop.permute.xlu2 %292 }
  0x9b   : > { %v256_v25 = vpop.permute.xlu0 %255  ;;  %v392_v49 = vperm.slane %v871_v23, 0  ;;  %v263_v22 = vrot.slane %v871_v23, 1 }
  0x9c   : > { %v328_v26 = vperm.slane %v256_v25, 0  ;;  %v262_v27 = vrot.slane %v256_v25, 1 }
  0x9d   : > { %407 = vrot.lane.b32.xlu0 %v390_v24, %s770_s19  ;;  %v400_v24 = vperm.slane %v263_v22, 0 }
  0x9e   : > { %347 = vrot.lane.b32.xlu1 %v328_v26, %s771_s20  ;;  %v336_v29 = vperm.slane %v262_v27, 0 }
  0xa2   : > { %v269_v28 = vpop.permute.xlu1 %268  ;;  %v891_v42 = vpop.permute.xlu2 %298 }
  0xa3   : > { %v329_v30 = vperm.slane %v269_v28, 0  ;;  %v876_v31 = vpop.permute.xlu0 %266  ;;  %v275_v53 = vrot.slane %v269_v28, 1  ;;  %v459_v25 = vperm.slane %v891_v42, 0 }
  0xa5   : > { %349 = vrot.lane.b32.xlu2 %v329_v30, %s771_s20  ;;  %363 = vrot.lane.b32.xlu0 %v336_v29, %s771_s20  ;;  %v337_v56 = vperm.slane %v275_v53, 0  ;;  %v462_v29 = vperm.slane %v238_v16, 0  ;;  %v251_v53 = vrot.slane %v868_v19, 1 }
  0xaa   : > { %v880_v32 = vpop.permute.xlu1 %279  ;;  %v310_v48 = vpop.permute.xlu2 %309 }
  0xab   : > { %v882_v33 = vpop.permute.xlu0 %272  ;;  %v396_v51 = vperm.slane %v310_v48, 0  ;;  %v315_v26 = vrot.slane %v310_v48, 1 }
  0xad   : > { %v404_v23 = vperm.slane %v315_v26, 0 }
  0xb2   : > { %v884_v34 = vpop.permute.xlu1 %285 }
  0xb3   : > { %v284_v35 = vpop.permute.xlu0 %283  ;;  %v290_v59 = vrot.slane %v884_v34, 1 }
  0xb4   : > { %v289_v60 = vrot.slane %v284_v35, 1  ;;  %v394_v5 = vperm.slane %v284_v35, 0  ;;  %v277_v35 = vrot.slane %v882_v33, 1 }
  0xb6   : > { %v402_v63 = vperm.slane %v289_v60, 0 }
  0xba   : > { %v888_v37 = vpop.permute.xlu1 %296 }
  0xbb   : > { %v295_v38 = vpop.permute.xlu0 %294  ;;  %v395_v4 = vperm.slane %v888_v37, 0  ;;  %v302_v27 = vrot.slane %v888_v37, 1  ;;  %v455_v37 = vperm.slane %v868_v19, 0 }
  0xbc   : > { %v301_v39 = vrot.slane %v295_v38, 1  ;;  %v331_v40 = vperm.slane %v295_v38, 0  ;;  %v938_v38 = vpop.permute.xlu2 %405 }
  0xbd   : > { %v403_v28 = vperm.slane %v302_v27, 0 }
  0xbe   : > { %v339_v41 = vperm.slane %v301_v39, 0  ;;  %353 = vrot.lane.b32.xlu1 %v331_v40, %s771_s20  ;;  %v454_v39 = vperm.slane %v863_v15, 0  ;;  %v465_v40 = vperm.slane %v277_v35, 0  ;;  %v225_v15 = vrot.slane %v813_v2, 1 }
  0xc0   : > { %369 = vrot.lane.b32.xlu0 %v339_v41, %s771_s20 }
  0xc2   : > { %v308_v43 = vpop.permute.xlu1 %307 }
  0xc3   : > { %v332_v44 = vperm.slane %v308_v43, 0  ;;  %v314_v58 = vrot.slane %v308_v43, 1  ;;  %v909_v3 = vpop.permute.xlu0 %305 }
  0xc5   : > { %355 = vrot.lane.b32.xlu2 %v332_v44, %s771_s20  ;;  %v340_v61 = vperm.slane %v314_v58, 0  ;;  %v458_v44 = vperm.slane %v884_v34, 0 }
  0xc6   : > { %409 = vrot.lane.b32.xlu1 %v391_v45, %s770_s19  ;;  %v457_v45 = vperm.slane %v882_v33, 0  ;;  %v461_v33 = vperm.slane %v225_v15, 0 }
  0xc8   : > { %413 = vrot.lane.b32.xlu0 %v393_v46, %s770_s19 }
  0xcb   : > { %v312_v18 = vpop.permute.xlu0 %311 }
  0xcc   : > { %v316_v43 = vrot.slane %v312_v18, 1 }
  0xcd   : > { %411 = vrot.lane.b32.xlu2 %v392_v49, %s770_s19 }
  0xce   : > { %359 = vrot.lane.b32.xlu1 %v334_v50, %s771_s20  ;;  %v468_v46 = vperm.slane %v316_v43, 0 }
  0xd0   : > { %419 = vrot.lane.b32.xlu0 %v396_v51, %s770_s19  ;;  %v460_v51 = vperm.slane %v312_v18, 0 }
  0xd3   : > { %v924_v12 = vpop.permute.xlu0 %357 }
  0xd5   : > { %361 = vrot.lane.b32.xlu2 %v335_v55, %s771_s20  ;;  %v463_v55 = vperm.slane %v251_v53, 0 }
  0xd6   : > { %365 = vrot.lane.b32.xlu1 %v337_v56, %s771_s20  ;;  %v342_v56 = vpop.permute.xlu1 %341 }
  0xd8   : > { %425 = vrot.lane.b32.xlu0 %v399_v57, %s770_s19  ;;  %v303_v57 = vrot.slane %v891_v42, 1 }
  0xda   : > { %v467_v60 = vperm.slane %v303_v57, 0  ;;  %v222_v57 = vrot.slane %v808_v1, 1 }
  0xdd   : > { %367 = vrot.lane.b32.xlu2 %v338_v62, %s771_s20 }
  0xde   : > { %371 = vrot.lane.b32.xlu1 %v340_v61, %s771_s20  ;;  %v466_v61 = vperm.slane %v290_v59, 0 }
  0xe0   : > { %431 = vrot.lane.b32.xlu0 %v402_v63, %s770_s19 }
  0xe5   : > { %417 = vrot.lane.b32.xlu2 %v395_v4, %s770_s19 }
  0xe6   : > { %415 = vrot.lane.b32.xlu1 %v394_v5, %s770_s19 }
  0xe7   : > { %v934_v30 = vpop.permute.xlu0 %345 }
  0xe8   : > { %469 = vrot.lane.b32.xlu0 %v453_v6, %s769_s18  ;;  %v344_v47 = vpop.permute.xlu2 %343 }
  0xe9   : > { %v519_v48 = vsel %vm517_vm0, %v861_v14, %v344_v47  ;;  %v520_v47 = vsel %vm517_vm0, %v848_v7, %v934_v30 }
  0xed   : > { %423 = vrot.lane.b32.xlu2 %v398_v17, %s770_s19 }
  0xee   : > { %421 = vrot.lane.b32.xlu1 %v397_v10, %s770_s19 }
  0xf0   : > { %475 = vrot.lane.b32.xlu0 %v456_v20, %s769_s18 }
  0xf5   : > { %429 = vrot.lane.b32.xlu2 %v401_v0, %s770_s19  ;;  %v248_v0 = vrot.slane %v848_v7, 1 }
  0xf6   : > { %427 = vrot.lane.b32.xlu1 %v400_v24, %s770_s19 }
  0xf8   : > { %481 = vrot.lane.b32.xlu0 %v459_v25, %s769_s18 }
  0xfd   : > { %435 = vrot.lane.b32.xlu2 %v404_v23, %s770_s19  ;;  %v287_v23 = vrot.slane %v880_v32, 1 }
  0xfe   : > { %433 = vrot.lane.b32.xlu1 %v403_v28, %s770_s19 }
  0xff   : > { %v350_v2 = vpop.permute.xlu2 %349 }
 0x100   : > { %487 = vrot.lane.b32.xlu0 %v462_v29, %s769_s18  ;;  %v522_v42 = vsel %vm517_vm0, %v876_v31, %v350_v2 }
 0x105   : > { %473 = vrot.lane.b32.xlu2 %v455_v37, %s769_s18 }
 0x106   : > { %471 = vrot.lane.b32.xlu1 %v454_v39, %s769_s18  ;;  %v518_v39 = vsel %vm517_vm0, %v808_v1, %v342_v56 }
 0x107   : > { %v944_v41 = vpop.permute.xlu0 %351 }
 0x108   : > { %493 = vrot.lane.b32.xlu0 %v465_v40, %s769_s18  ;;  %v523_v7 = vsel %vm517_vm0, %v880_v32, %v944_v41  ;;  %v526_v41 = vsel %vm517_vm0, %v222_v57, %v924_v12  ;;  %v261_v12 = vrot.slane %v855_v11, 1 }
 0x10d   : > { %479 = vrot.lane.b32.xlu2 %v458_v44, %s769_s18  ;;  %v535_v44 = vsel %vm534_vm1, %v518_v39, %v938_v38 }
 0x10e   : > { %477 = vrot.lane.b32.xlu1 %v457_v45, %s769_s18 }
 0x10f   : > { %v408_v49 = vpop.permute.xlu0 %407 }
 0x110   : > { %499 = vrot.lane.b32.xlu0 %v468_v46, %s769_s18  ;;  %v956_v50 = vsel %vm534_vm1, %v519_v48, %v408_v49  ;;  %v348_v19 = vpop.permute.xlu1 %347 }
 0x115   : > { %485 = vrot.lane.b32.xlu2 %v461_v33, %s769_s18 }
 0x116   : > { %483 = vrot.lane.b32.xlu1 %v460_v51, %s769_s18  ;;  %v521_v51 = vsel %vm517_vm0, %v855_v11, %v348_v19 }
 0x117   : > { %v968_v62 = vpop.permute.xlu0 %363 }
 0x11d   : > { %491 = vrot.lane.b32.xlu2 %v464_v54, %s769_s18 }
 0x11e   : > { %489 = vrot.lane.b32.xlu1 %v463_v55, %s769_s18 }
 0x11f   : > { %v356_v58 = vpop.permute.xlu2 %355 }
 0x120   : > { %v525_v18 = vsel %vm517_vm0, %v909_v3, %v356_v58 }
 0x125   : > { %497 = vrot.lane.b32.xlu2 %v467_v60, %s769_s18  ;;  %v235_v60 = vrot.slane %v861_v14, 1  ;;  %v529_v14 = vsel %vm517_vm0, %v261_v12, %v968_v62 }
 0x126   : > { %495 = vrot.lane.b32.xlu1 %v466_v61, %s769_s18 }
 0x127   : > { %v412_v13 = vpop.permute.xlu2 %411 }
 0x128   : > { %v538_v38 = vsel %vm534_vm1, %v521_v51, %v412_v13 }
 0x12f   : > { %v362_v63 = vpop.permute.xlu2 %361 }
 0x130   : > { %v354_v4 = vpop.permute.xlu1 %353  ;;  %v528_v25 = vsel %vm517_vm0, %v248_v0, %v362_v63  ;;  %v300_v0 = vrot.slane %v886_v36, 1 }
 0x131   : > { %v524_v56 = vsel %vm517_vm0, %v886_v36, %v354_v4 }
 0x132   : > { %v970_v5 = vpop.permute.xlu0 %369 }
 0x137   : > { %v368_v6 = vpop.permute.xlu2 %367 }
 0x138   : > { %v410_v8 = vpop.permute.xlu1 %409  ;;  %v531_v29 = vsel %vm517_vm0, %v287_v23, %v368_v6 }
 0x139   : > { %v537_v15 = vsel %vm534_vm1, %v520_v47, %v410_v8 }
 0x13a   : > { %v414_v34 = vpop.permute.xlu0 %413 }
 0x13b   : > { %v975_v9 = vsel %vm534_vm1, %v522_v42, %v414_v34  ;;  %v274_v42 = vrot.slane %v876_v31, 1 }
 0x13f   : > { %v418_v10 = vpop.permute.xlu2 %417 }
 0x140   : > { %v360_v17 = vpop.permute.xlu1 %359  ;;  %v541_v58 = vsel %vm534_vm1, %v524_v56, %v418_v10 }
 0x141   : > { %v527_v63 = vsel %vm517_vm0, %v235_v60, %v360_v17 }
 0x142   : > { %v420_v20 = vpop.permute.xlu0 %419 }
 0x143   : > { %v980_v21 = vsel %vm534_vm1, %v525_v18, %v420_v20 }
 0x147   : > { %v424_v22 = vpop.permute.xlu2 %423 }
 0x148   : > { %v983_v24 = vpop.permute.xlu1 %365  ;;  %v544_v4 = vsel %vm534_vm1, %v527_v63, %v424_v22 }
 0x149   : > { %v530_v20 = vsel %vm517_vm0, %v274_v42, %v983_v24  ;;  %v532_v24 = vsel %vm517_vm0, %v300_v0, %v970_v5 }
 0x14a   : > { %v426_v26 = vpop.permute.xlu0 %425 }
 0x14b   : > { %v987_v27 = vsel %vm534_vm1, %v528_v25, %v426_v26 }
 0x14f   : > { %v989_v16 = vpop.permute.xlu2 %429 }
 0x150   : > { %v992_v28 = vpop.permute.xlu1 %371  ;;  %v547_v62 = vsel %vm534_vm1, %v530_v20, %v989_v16 }
 0x152   : > { %v432_v35 = vpop.permute.xlu0 %431 }
 0x153   : > { %v996_v37 = vsel %vm534_vm1, %v531_v29, %v432_v35 }
 0x157   : > { %v1001_v40 = vpop.permute.xlu2 %435 }
 0x158   : > { %v416_v43 = vpop.permute.xlu1 %415 }
 0x159   : > { %v540_v30 = vsel %vm534_vm1, %v523_v7, %v416_v43 }
 0x15a   : > { %v470_v45 = vpop.permute.xlu0 %469 }
 0x15b   : > { %v552_v46 = vsel %vm551_vm2, %v535_v44, %v470_v45 }
 0x15c   : > { %569 = vst.msk [vmem:[%s1006_s24] sm:$0x1] %vm568_vm3, %v552_v46 }
 0x15f   : > { %v474_v48 = vpop.permute.xlu2 %473 }
 0x160   : > { %v554_v49 = vsel %vm551_vm2, %v537_v15, %v474_v48  ;;  %v422_v33 = vpop.permute.xlu1 %421 }
 0x161   : > { %571 = vst.msk [vmem:[%s1006_s24 + $0x2] sm:$0x1] %vm568_vm3, %v554_v49  ;;  %v543_v61 = vsel %vm534_vm1, %v526_v41, %v422_v33 }
 0x162   : > { %v476_v52 = vpop.permute.xlu0 %475 }
 0x163   : > { %v555_v2 = vsel %vm551_vm2, %v538_v38, %v476_v52 }
 0x164   : > { %572 = vst.msk [vmem:[%s1006_s24 + $0x3] sm:$0x1] %vm568_vm3, %v555_v2 }
 0x167   : > { %v480_v53 = vpop.permute.xlu2 %479 }
 0x168   : > { %v557_v54 = vsel %vm551_vm2, %v540_v30, %v480_v53  ;;  %v428_v55 = vpop.permute.xlu1 %427 }
 0x169   : > { %574 = vst.msk [vmem:[%s1006_s24 + $0x5] sm:$0x1] %vm568_vm3, %v557_v54  ;;  %v546_v34 = vsel %vm534_vm1, %v529_v14, %v428_v55 }
 0x16a   : > { %v482_v59 = vpop.permute.xlu0 %481 }
 0x16b   : > { %v558_v32 = vsel %vm551_vm2, %v541_v58, %v482_v59 }
 0x16c   : > { %575 = vst.msk [vmem:[%s1006_s24 + $0x6] sm:$0x1] %vm568_vm3, %v558_v32 }
 0x16f   : > { %v486_v13 = vpop.permute.xlu2 %485 }
 0x170   : > { %v560_v19 = vsel %vm551_vm2, %v543_v61, %v486_v13  ;;  %v434_v1 = vpop.permute.xlu1 %433 }
 0x171   : > { %577 = vst.msk [vmem:[%s1006_s24 + $0x8] sm:$0x1] %vm568_vm3, %v560_v19  ;;  %v549_v25 = vsel %vm534_vm1, %v532_v24, %v434_v1 }
 0x172   : > { %v488_v6 = vpop.permute.xlu0 %487 }
 0x173   : > { %v561_v8 = vsel %vm551_vm2, %v544_v4, %v488_v6 }
 0x174   : > { %578 = vst.msk [vmem:[%s1006_s24 + $0x9] sm:$0x1] %vm568_vm3, %v561_v8 }
 0x177   : > { %v492_v10 = vpop.permute.xlu2 %491 }
 0x178   : > { %v563_v17 = vsel %vm551_vm2, %v546_v34, %v492_v10  ;;  %v472_v18 = vpop.permute.xlu1 %471 }
 0x179   : > { %580 = vst.msk [vmem:[%s1006_s24 + $0xb] sm:$0x1] %vm568_vm3, %v563_v17  ;;  %v553_v11 = vsel %vm551_vm2, %v956_v50, %v472_v18  ;;  %v313_v50 = vrot.slane %v909_v3, 1 }
 0x17a   : > { %570 = vst.msk [vmem:[%s1006_s24 + $0x1] sm:$0x1] %vm568_vm3, %v553_v11  ;;  %v494_v31 = vpop.permute.xlu0 %493 }
 0x17b   : > { %v564_v22 = vsel %vm551_vm2, %v547_v62, %v494_v31  ;;  %v533_v29 = vsel %vm517_vm0, %v313_v50, %v992_v28 }
 0x17c   : > { %581 = vst.msk [vmem:[%s1006_s24 + $0xc] sm:$0x1] %vm568_vm3, %v564_v22  ;;  %v550_v5 = vsel %vm534_vm1, %v533_v29, %v1001_v40 }
 0x17f   : > { %v498_v26 = vpop.permute.xlu2 %497 }
 0x180   : > { %v566_v16 = vsel %vm551_vm2, %v549_v25, %v498_v26  ;;  %v478_v23 = vpop.permute.xlu1 %477 }
 0x181   : > { %583 = vst.msk [vmem:[%s1006_s24 + $0xe] sm:$0x1] %vm568_vm3, %v566_v16  ;;  %v556_v36 = vsel %vm551_vm2, %v975_v9, %v478_v23 }
 0x182   : > { %573 = vst.msk [vmem:[%s1006_s24 + $0x4] sm:$0x1] %vm568_vm3, %v556_v36  ;;  %v500_v3 = vpop.permute.xlu0 %499 }
 0x183   : > { %v567_v35 = vsel %vm551_vm2, %v550_v5, %v500_v3 }
 0x184   : > { %584 = vst.msk [vmem:[%s1006_s24 + $0xf] sm:$0x1] %vm568_vm3, %v567_v35 }
 0x188   : > { %v484_v39 = vpop.permute.xlu1 %483 }
 0x189   : > { %v559_v28 = vsel %vm551_vm2, %v980_v21, %v484_v39 }
 0x18a   : > { %576 = vst.msk [vmem:[%s1006_s24 + $0x7] sm:$0x1] %vm568_vm3, %v559_v28 }
 0x190   : > { %v490_v43 = vpop.permute.xlu1 %489 }
 0x191   : > { %v562_v9 = vsel %vm551_vm2, %v987_v27, %v490_v43 }
 0x192   : > { %579 = vst.msk [vmem:[%s1006_s24 + $0xa] sm:$0x1] %vm568_vm3, %v562_v9 }
 0x198   : > { %v496_v40 = vpop.permute.xlu1 %495 }
 0x199   : > { %v565_v44 = vsel %vm551_vm2, %v996_v37, %v496_v40 }
 0x19a   : > { %582 = vst.msk [vmem:[%s1006_s24 + $0xd] sm:$0x1] %vm568_vm3, %v565_v44 }
 0x19b PF: > { %s11_s8 = sadd.s32 1, %s763_s8   ;;  %s1113_s6 = smov %s759_s7 }
 0x19c   : > { %p8_p5 = scmp.ge.s32.totalorder %s11_s8, 4   ;;  %s1114_s7 = smov %s1116_s9 }
 0x19e   :  { %10 = sbr.rel (!%p8_p5) target bundleno = 2 (0x2), region = 54 }

</bundles_post_ra>
